<compile_context>
chip_gen: v7x
topology: tpu7x:2x2x1
jax: 0.10.0
libtpu: 0.0.40
codegen_flags: <defaults>
</compile_context>

<pallas_src>
import math
import functools

import jax
import jax.numpy as jnp
from jax.experimental import pallas as pl
from jax.experimental.pallas import tpu as pltpu


def _round_up(a, b):
    return ((a + b - 1) // b) * b


# ---------------------------------------------------------------------------
# Kernel: y = relu(x @ W1 + b1) @ W2 + b2  for one (bm, d_model_padded) block
# ---------------------------------------------------------------------------
def _ffn_kernel(x_ref, w1_ref, b1_ref, w2_ref, b2_ref, o_ref, *, compute_dtype):
    # x_ref / w*_ref are bf16 (or f32), biases f32, output f32.
    h = jnp.dot(x_ref[...], w1_ref[...],
                preferred_element_type=jnp.float32)           # (bm, dhp) f32
    h = jnp.maximum(h + b1_ref[...], 0.0)                     # bias + ReLU in f32

    y = jnp.dot(h.astype(compute_dtype), w2_ref[...],
                preferred_element_type=jnp.float32)           # (bm, dmp) f32
    o_ref[...] = (y + b2_ref[...]).astype(o_ref.dtype)


# ---------------------------------------------------------------------------
# Wrapper
# ---------------------------------------------------------------------------
def feedforward(x, w1, b1, w2, b2, *, block_m=512, use_bf16_matmul=True):
    """FeedForward.forward: relu(x @ w1 + b1) @ w2 + b2, fused in one kernel.

    x : (..., d_model) float32
    w1: (d_model, d_hidden)   b1: (d_hidden,) or (1, d_hidden)
    w2: (d_hidden, d_model)   b2: (d_model,) or (1, d_model)
    """
    orig_shape = x.shape
    d_model = orig_shape[-1]
    d_hidden = w1.shape[1]

    # Fold every leading dim into the matmul M dimension.
    M = 1
    for s in orig_shape[:-1]:
        M *= s

    compute_dtype = jnp.bfloat16 if use_bf16_matmul else jnp.float32

    # Pad feature dims to lane width (128): full MXU tiles + unmasked stores.
    dmp = _round_up(d_model, 128)
    dhp = _round_up(d_hidden, 128)

    x2d = x.reshape(M, d_model).astype(compute_dtype)
    w1c = w1.astype(compute_dtype)
    w2c = w2.astype(compute_dtype)
    b1r = b1.reshape(1, d_hidden).astype(jnp.float32)
    b2r = b2.reshape(1, d_model).astype(jnp.float32)

    if dmp != d_model:
        x2d = jnp.pad(x2d, ((0, 0), (0, dmp - d_model)))
        w1c = jnp.pad(w1c, ((0, dmp - d_model), (0, 0)))
        w2c = jnp.pad(w2c, ((0, 0), (0, dmp - d_model)))
        b2r = jnp.pad(b2r, ((0, 0), (0, dmp - d_model)))
    if dhp != d_hidden:
        w1c = jnp.pad(w1c, ((0, 0), (0, dhp - d_hidden)))
        b1r = jnp.pad(b1r, ((0, 0), (0, dhp - d_hidden)))
        w2c = jnp.pad(w2c, ((0, dhp - d_hidden), (0, 0)))

    # Tile M (sublane dim must be a multiple of 8, or the full extent).
    bm = min(block_m, _round_up(M, 8))
    Mp = _round_up(M, bm)
    if Mp != M:
        x2d = jnp.pad(x2d, ((0, Mp - M), (0, 0)))

    grid = (Mp // bm,)
    kern = functools.partial(_ffn_kernel, compute_dtype=compute_dtype)

    out = pl.pallas_call(
        kern,
        grid=grid,
        in_specs=[
            pl.BlockSpec((bm, dmp), lambda i: (i, 0)),     # x row-block
            pl.BlockSpec((dmp, dhp), lambda i: (0, 0)),    # W1 (VMEM-resident)
            pl.BlockSpec((1, dhp), lambda i: (0, 0)),      # b1
            pl.BlockSpec((dhp, dmp), lambda i: (0, 0)),    # W2 (VMEM-resident)
            pl.BlockSpec((1, dmp), lambda i: (0, 0)),      # b2
        ],
        out_specs=pl.BlockSpec((bm, dmp), lambda i: (i, 0)),
        out_shape=jax.ShapeDtypeStruct((Mp, dmp), jnp.float32),
        compiler_params=pltpu.CompilerParams(
            dimension_semantics=("parallel",)),
    )(x2d, w1c, b1r, w2c, b2r)

    out = out[:M, :d_model]
    return out.reshape(orig_shape[:-1] + (d_model,))


# ---------------------------------------------------------------------------
if __name__ == "__main__":
    # Small shapes consistent with the module: (batch, seq, d_model).
    B, T, d_model, d_hidden = 2, 8, 32, 128

    key = jax.random.PRNGKey(0)
    kx, k1, k2, k3, k4 = jax.random.split(key, 5)
    lim1 = 1.0 / math.sqrt(d_model)
    lim2 = 1.0 / math.sqrt(d_hidden)

    x = jax.random.normal(kx, (B, T, d_model), jnp.float32)
    w1 = jax.random.uniform(k1, (d_model, d_hidden), jnp.float32, -lim1, lim1)
    b1 = jax.random.uniform(k2, (d_hidden,), jnp.float32, -lim1, lim1)
    w2 = jax.random.uniform(k3, (d_hidden, d_model), jnp.float32, -lim2, lim2)
    b2 = jax.random.uniform(k4, (d_model,), jnp.float32, -lim2, lim2)

    y = feedforward(x, w1, b1, w2, b2)
    jax.block_until_ready(y)

    # Pure-JAX f32 reference; loose tolerance accounts for bf16 MXU operands.
    ref = jnp.maximum(x @ w1 + b1, 0.0) @ w2 + b2
    assert y.shape == ref.shape == (B, T, d_model)
    max_err = float(jnp.max(jnp.abs(y - ref)))
    assert max_err < 5e-2, f"max abs err {max_err}"

    print("KERNEL_OK")
</pallas_src>

<mosaic_0001>
module attributes {stable_mosaic.version = 11 : i64} {
  func.func @_ffn_kernel(%arg0: i32, %arg1: memref<16x128xbf16, #tpu.memory_space<vmem>>, %arg2: memref<128x128xbf16, #tpu.memory_space<vmem>>, %arg3: memref<1x128xf32, #tpu.memory_space<vmem>>, %arg4: memref<128x128xbf16, #tpu.memory_space<vmem>>, %arg5: memref<1x128xf32, #tpu.memory_space<vmem>>, %arg6: memref<16x128xf32, #tpu.memory_space<vmem>>) attributes {dimension_semantics = [#tpu.dimension_semantics<parallel>], iteration_bounds = array<i64: 1>, scalar_prefetch = 0 : i64, scratch_operands = 0 : i64, tpu.core_type = #tpu.core_type<tc>, window_params = [{transform_indices = @transform_0, window_bounds = array<i64: 16, 128>}, {pipeline_mode = #tpu.pipeline_mode<synchronous>, transform_indices = @transform_1, window_bounds = array<i64: 128, 128>}, {pipeline_mode = #tpu.pipeline_mode<synchronous>, transform_indices = @transform_2, window_bounds = array<i64: 1, 128>}, {pipeline_mode = #tpu.pipeline_mode<synchronous>, transform_indices = @transform_3, window_bounds = array<i64: 128, 128>}, {pipeline_mode = #tpu.pipeline_mode<synchronous>, transform_indices = @transform_4, window_bounds = array<i64: 1, 128>}, {transform_indices = @transform_5, window_bounds = array<i64: 16, 128>}]} {
    %c0 = arith.constant 0 : index
    %c0_0 = arith.constant 0 : index
    %0 = vector.load %arg1[%c0, %c0_0] : memref<16x128xbf16, #tpu.memory_space<vmem>>, vector<16x128xbf16>
    %c0_1 = arith.constant 0 : index
    %c0_2 = arith.constant 0 : index
    %1 = vector.load %arg2[%c0_1, %c0_2] : memref<128x128xbf16, #tpu.memory_space<vmem>>, vector<128x128xbf16>
    %cst = arith.constant dense<0.000000e+00> : vector<16x128xf32>
    %2 = tpu.matmul %0, %1, %cst {dimension_numbers = #tpu.dot_dimension_numbers<[1], [0], [0], [1], [0, 0, 1, 1], [], []>} : vector<16x128xbf16>, vector<128x128xbf16>, vector<16x128xf32> -> vector<16x128xf32>
    %c0_3 = arith.constant 0 : index
    %c0_4 = arith.constant 0 : index
    %3 = vector.load %arg3[%c0_3, %c0_4] : memref<1x128xf32, #tpu.memory_space<vmem>>, vector<1x128xf32>
    %4 = vector.broadcast %3 : vector<1x128xf32> to vector<16x128xf32>
    %5 = arith.addf %2, %4 : vector<16x128xf32>
    %cst_5 = arith.constant 0.000000e+00 : f32
    %6 = vector.broadcast %cst_5 : f32 to vector<16x128xf32>
    %7 = arith.maximumf %5, %6 : vector<16x128xf32>
    %8 = arith.truncf %7 : vector<16x128xf32> to vector<16x128xbf16>
    %c0_6 = arith.constant 0 : index
    %c0_7 = arith.constant 0 : index
    %9 = vector.load %arg4[%c0_6, %c0_7] : memref<128x128xbf16, #tpu.memory_space<vmem>>, vector<128x128xbf16>
    %cst_8 = arith.constant dense<0.000000e+00> : vector<16x128xf32>
    %10 = tpu.matmul %8, %9, %cst_8 {dimension_numbers = #tpu.dot_dimension_numbers<[1], [0], [0], [1], [0, 0, 1, 1], [], []>} : vector<16x128xbf16>, vector<128x128xbf16>, vector<16x128xf32> -> vector<16x128xf32>
    %c0_9 = arith.constant 0 : index
    %c0_10 = arith.constant 0 : index
    %11 = vector.load %arg5[%c0_9, %c0_10] : memref<1x128xf32, #tpu.memory_space<vmem>>, vector<1x128xf32>
    %12 = vector.broadcast %11 : vector<1x128xf32> to vector<16x128xf32>
    %13 = arith.addf %10, %12 : vector<16x128xf32>
    %c0_11 = arith.constant 0 : index
    %c0_12 = arith.constant 0 : index
    %14 = vector.load %arg6[%c0_11, %c0_12] : memref<16x128xf32, #tpu.memory_space<vmem>>, vector<16x128xf32>
    tpu.vector_store %arg6[%c0_11, %c0_12], %13 {strides = array<i32>} : memref<16x128xf32, #tpu.memory_space<vmem>>, vector<16x128xf32>,
    return
  }
  func.func @transform_0(%arg0: i32) -> (i32, i32) {
    %c0_i32 = arith.constant 0 : i32
    %c0_i32_0 = arith.constant 0 : i32
    return %arg0, %c0_i32 : i32, i32
  }
  func.func @transform_1(%arg0: i32) -> (i32, i32) {
    %c0_i32 = arith.constant 0 : i32
    %c0_i32_0 = arith.constant 0 : i32
    %c0_i32_1 = arith.constant 0 : i32
    return %c0_i32, %c0_i32_0 : i32, i32
  }
  func.func @transform_2(%arg0: i32) -> (i32, i32) {
    %c0_i32 = arith.constant 0 : i32
    %c0_i32_0 = arith.constant 0 : i32
    %c0_i32_1 = arith.constant 0 : i32
    return %c0_i32, %c0_i32_0 : i32, i32
  }
  func.func @transform_3(%arg0: i32) -> (i32, i32) {
    %c0_i32 = arith.constant 0 : i32
    %c0_i32_0 = arith.constant 0 : i32
    %c0_i32_1 = arith.constant 0 : i32
    return %c0_i32, %c0_i32_0 : i32, i32
  }
  func.func @transform_4(%arg0: i32) -> (i32, i32) {
    %c0_i32 = arith.constant 0 : i32
    %c0_i32_0 = arith.constant 0 : i32
    %c0_i32_1 = arith.constant 0 : i32
    return %c0_i32, %c0_i32_0 : i32, i32
  }
  func.func @transform_5(%arg0: i32) -> (i32, i32) {
    %c0_i32 = arith.constant 0 : i32
    %c0_i32_0 = arith.constant 0 : i32
    return %arg0, %c0_i32 : i32, i32
  }
}

</mosaic_0001>

<bundles_post_ra>
// kernel: tpu_custom_call.1
= control target key start
LH: loop header
LB: loop body
LE: loop exit
PB: predicated region body
PF: predicated region fallthrough
CT: control target
= control target key end

     0   :  { %10 = vsyncpa [#allocation3], 0  ;;  %s626_s0 = inlined_call_operand.hbm [shape: bf16[16,128], index: 0, kind: input, shape index: {}]   ;;  %s627_s1 = inlined_call_operand.hbm [shape: bf16[128,128], index: 1, kind: input, shape index: {}]   ;;  %s628_s2 = inlined_call_operand.vmem [shape: f32[1,128], index: 2, kind: input, shape index: {}]   ;;  %s629_s3 = inlined_call_operand.hbm [shape: bf16[128,128], index: 3, kind: input, shape index: {}]   ;;  %s630_s4 = inlined_call_operand.vmem [shape: f32[1,128], index: 4, kind: input, shape index: {}]   ;;  %s631_s5 = inlined_call_operand.hbm [shape: f32[16,128], index: 5, kind: output, shape index: {}]  }
   0x1   :  { %11 = vsyncpa [#allocation6], 0 }
   0x2   :  { %12 = vsyncpa [#allocation4], 0  ;;  %s516_s18 = smov [#allocation5]   ;;  %s517_s20 = smov [#allocation2]  }
   0x3   :  { %s30_s19 = sshll.u32 %s516_s18, 4  ;;  %s18_s21 = sshll.u32 %s517_s20, 4  ;;  %s31_s19 = int_to_ptr.vmem [resolvable:$true] %s30_s19  ;;  %s556_s21 = int_to_ptr.vmem [resolvable:$true] %s18_s21 }
   0x4   :  { %s422_s24 = scalar_lea.hbm %s627_s1, 1024 }
   0x5   :  { %p423_p0 = scmp.ne.s32.totalorder %s627_s1, %s422_s24  ;;  %p426_p1 = scmp.lt.u32.totalorder %s422_s24, %s627_s1 }
   0x7   :  { %p428_p2 = pnand %p426_p1, %p423_p0 }
   0x9   :  { %431 = shalt.err (!%p428_p2)
}
   0xa   :  { %s432_s29 = scalar_lea.vmem %s31_s19, 1024  ;;  %p437_p4 = scmp.lt.s32.totalorder %s31_s19, %s31_s19 }
   0xb   :  { %p433_p3 = scmp.ne.s32.totalorder %s31_s19, %s432_s29  ;;  %p438_p5 = scmp.lt.s32.totalorder %s432_s29, %s432_s29 }
   0xd   :  { %p439_p6 = por %p438_p5, %p437_p4 }
   0xf   :  { %p440_p7 = pnand %p439_p6, %p433_p3 }
  0x11   :  { %443 = shalt.err (!%p440_p7)
}
  0x12   :  { %s518_s30 = smov 64   ;;  %s519_s6 = smov 4  }
  0x13   :  { %36 = dma.hbm_to_vmem [thread:$0]  %s627_s1, 1024, %s31_s19, [#allocation6], %s518_s30, %s518_s30, %s519_s6  }
  0x14   :  { %s444_s11 = scalar_lea.hbm %s626_s0, 128 }
  0x15   :  { %p445_p8 = scmp.ne.s32.totalorder %s626_s0, %s444_s11  ;;  %p448_p9 = scmp.lt.u32.totalorder %s444_s11, %s626_s0 }
  0x17   :  { %p450_p10 = pnand %p448_p9, %p445_p8 }
  0x19   :  { %453 = shalt.err (!%p450_p10)
}
  0x1a   :  { %s454_s16 = scalar_lea.vmem %s556_s21, 128  ;;  %p459_p12 = scmp.lt.s32.totalorder %s556_s21, %s556_s21 }
  0x1b   :  { %p455_p11 = scmp.ne.s32.totalorder %s556_s21, %s454_s16  ;;  %p460_p13 = scmp.lt.s32.totalorder %s454_s16, %s454_s16 }
  0x1d   :  { %p461_p0 = por %p460_p13, %p459_p12 }
  0x1f   :  { %p462_p1 = pnand %p461_p0, %p455_p11 }
  0x21   :  { %465 = shalt.err (!%p462_p1)
}
  0x22   :  { %24 = dma.hbm_to_vmem [thread:$0]  %s626_s0, 128, %s556_s21, [#allocation3], %s518_s30, %s518_s30, %s519_s6  }
  0x23   :  { %s520_s18 = smov [#allocation7]   ;;  %s466_s23 = scalar_lea.hbm %s629_s3, 1024 }
  0x24   :  { %s44_s19 = sshll.u32 %s520_s18, 4  ;;  %p467_p2 = scmp.ne.s32.totalorder %s629_s3, %s466_s23  ;;  %s45_s19 = int_to_ptr.vmem [resolvable:$true] %s44_s19 }
  0x25   :  { %p470_p3 = scmp.lt.u32.totalorder %s466_s23, %s629_s3 }
  0x27   :  { %p472_p4 = pnand %p470_p3, %p467_p2 }
  0x29   :  { %475 = shalt.err (!%p472_p4)
}
  0x2a   :  { %s476_s28 = scalar_lea.vmem %s45_s19, 1024  ;;  %p481_p6 = scmp.lt.s32.totalorder %s45_s19, %s45_s19 }
  0x2b   :  { %p477_p5 = scmp.ne.s32.totalorder %s45_s19, %s476_s28  ;;  %p482_p7 = scmp.lt.s32.totalorder %s476_s28, %s476_s28 }
  0x2d   :  { %p483_p8 = por %p482_p7, %p481_p6 }
  0x2f   :  { %p484_p9 = pnand %p483_p8, %p477_p5 }
  0x31   :  { %487 = shalt.err (!%p484_p9)
}
  0x32   :  { %50 = dma.hbm_to_vmem [thread:$0]  %s629_s3, 1024, %s45_s19, [#allocation6], %s518_s30, %s518_s30, %s519_s6  }
  0x33   :  { %510 = dma.done.wait [#allocation3], 128  }
  0x34   :  { %511 = vsyncadd [#allocation3], 4294967168 }
  0x35   :  { %512 = dma.done.wait [#allocation6], 2048  }
  0x36   :  { %513 = vsyncadd [#allocation6], 4294965248  ;;  %v521_v0 = vmov 0.0   ;;  %vm522_vm0 = vmmov 0   ;;  %v405_v1 = vld [vmem:[#allocation5] sm:$0xff]   ;;  %v406_v2 = vld [vmem:[#allocation5 + $0x8] sm:$0xff]  }
  0x37   :  { %355 = vmatprep.subr.bf16.mxu0 %v521_v0  ;;  %371 = vmatprep.mubr.msk.bf16.mxu0 %vm522_vm0, %v521_v0  ;;  %v407_v3 = vld [vmem:[#allocation5 + $0x10] sm:$0xff]   ;;  %v414_v4 = vld [vmem:[#allocation7] sm:$0xff]   ;;  %v408_v5 = vld [vmem:[#allocation5 + $0x18] sm:$0xff]   ;;  %s523_s7 = smov [#allocation8]  }
  0x38   :  { %375 = vmatprep.subr.bf16.mxu1 %v521_v0  ;;  %391 = vmatprep.mubr.msk.bf16.mxu1 %vm522_vm0, %v521_v0  ;;  %v415_v6 = vld [vmem:[#allocation7 + $0x8] sm:$0xff]   ;;  %v409_v7 = vld [vmem:[#allocation5 + $0x20] sm:$0xff]   ;;  %v416_v8 = vld [vmem:[#allocation7 + $0x10] sm:$0xff]   ;;  %s305_s8 = sshll.u32 %s523_s7, 4  ;;  %s306_s8 = int_to_ptr.vmem [resolvable:$true] %s305_s8 }
  0x39   :  { %356 = vmatpush3.bf16.msra.mxu0 %v405_v1  ;;  %376 = vmatpush3.bf16.msra.mxu1 %v414_v4  ;;  %v410_v9 = vld [vmem:[#allocation5 + $0x28] sm:$0xff]   ;;  %v417_v10 = vld [vmem:[#allocation7 + $0x18] sm:$0xff]   ;;  %v411_v11 = vld [vmem:[#allocation5 + $0x30] sm:$0xff]   ;;  %p493_p11 = scmp.lt.s32.totalorder %s306_s8, %s306_s8 }
  0x3a   :  { %357 = vmatprep.subr.bf16.mxu0 %v521_v0  ;;  %377 = vmatprep.subr.bf16.mxu1 %v521_v0  ;;  %v418_v12 = vld [vmem:[#allocation7 + $0x20] sm:$0xff]   ;;  %v412_v13 = vld [vmem:[#allocation5 + $0x38] sm:$0xff]   ;;  %v419_v14 = vld [vmem:[#allocation7 + $0x28] sm:$0xff]  }
  0x3b   :  { %v413_v15 = vld [vmem:[#allocation2] sm:$0xff]   ;;  %v420_v16 = vld [vmem:[#allocation7 + $0x30] sm:$0xff]  }
  0x3c   :  { %v421_v17 = vld [vmem:[#allocation7 + $0x38] sm:$0xff]  }
  0x3d   :  { %358 = vmatpush3.bf16.msra.mxu0 %v406_v2  ;;  %378 = vmatpush3.bf16.msra.mxu1 %v415_v6  ;;  %v318_v18 = vld [vmem:[%s628_s2] ss:$0 sm:$0xff]  ;;  %s488_s2 = scalar_lea.vmem %s306_s8, 256 }
  0x3e   :  { %359 = vmatprep.subr.bf16.mxu0 %v521_v0  ;;  %379 = vmatprep.subr.bf16.mxu1 %v521_v0  ;;  %v328_v28 = vld [vmem:[%s630_s4] ss:$0 sm:$0xff]  ;;  %p489_p10 = scmp.ne.s32.totalorder %s306_s8, %s488_s2  ;;  %p494_p12 = scmp.lt.s32.totalorder %s488_s2, %s488_s2 }
  0x40   :  { %p495_p13 = por %p494_p12, %p493_p11 }
  0x41   :  { %360 = vmatpush3.bf16.msra.mxu0 %v407_v3  ;;  %380 = vmatpush3.bf16.msra.mxu1 %v416_v8 }
  0x42   :  { %361 = vmatprep.subr.bf16.mxu0 %v521_v0  ;;  %381 = vmatprep.subr.bf16.mxu1 %v521_v0  ;;  %p496_p0 = pnand %p495_p13, %p489_p10 }
  0x45   :  { %362 = vmatpush3.bf16.msra.mxu0 %v408_v5  ;;  %382 = vmatpush3.bf16.msra.mxu1 %v417_v10 }
  0x46   :  { %363 = vmatprep.subr.bf16.mxu0 %v521_v0  ;;  %383 = vmatprep.subr.bf16.mxu1 %v521_v0 }
  0x49   :  { %364 = vmatpush3.bf16.msra.mxu0 %v409_v7  ;;  %384 = vmatpush3.bf16.msra.mxu1 %v418_v12 }
  0x4a   :  { %365 = vmatprep.subr.bf16.mxu0 %v521_v0  ;;  %385 = vmatprep.subr.bf16.mxu1 %v521_v0 }
  0x4d   :  { %366 = vmatpush3.bf16.msra.mxu0 %v410_v9  ;;  %386 = vmatpush3.bf16.msra.mxu1 %v419_v14 }
  0x4e   :  { %367 = vmatprep.subr.bf16.mxu0 %v521_v0  ;;  %387 = vmatprep.subr.bf16.mxu1 %v521_v0 }
  0x51   :  { %368 = vmatpush3.bf16.msra.mxu0 %v411_v11  ;;  %388 = vmatpush3.bf16.msra.mxu1 %v420_v16 }
  0x52   :  { %369 = vmatprep.subr.bf16.mxu0 %v521_v0  ;;  %389 = vmatprep.subr.bf16.mxu1 %v521_v0 }
  0x55   :  { %370 = vmatpush3.bf16.msra.mxu0 %v412_v13  ;;  %390 = vmatpush3.bf16.msra.mxu1 %v421_v17 }
  0x58   :  { %372 = vmatmul.mubr.bf16.vlgmr.msra.gmra.mrb[0].mxu0 %v413_v15 }
 0x12b   :  { %v176_v19 = vpop.f32.mrb[0].mxu0 }
 0x12c   :  { %v177_v20 = vadd.f32 %v318_v18, %v176_v19  ;;  %v373_v21 = vpop.f32.mrb[1].mxu0 }
 0x12d   :  { %v179_v22 = vpop.f32.mrb[2].mxu0 }
 0x12e   :  { %v180_v23 = vadd.f32 %v318_v18, %v179_v22  ;;  %v374_v24 = vpop.f32.mrb[3].mxu0  ;;  %v183_v25 = vmax.f32 %v177_v20, 0.0 }
 0x130   :  { %v184_v26 = vmax.f32 %v180_v23, 0.0 }
 0x132   :  { %v185_v27 = vpack.c.bf16 %v184_v26, %v183_v25 }
 0x134   :  { %392 = vmatmul.mubr.bf16.vlgmr.msra.gmra.mrb[0].mxu1 %v185_v27 }
 0x207   :  { %v291_v29 = vpop.f32.mrb[0].mxu1 }
 0x208   :  { %v292_v30 = vadd.f32 %v328_v28, %v291_v29  ;;  %v393_v31 = vpop.f32.mrb[1].mxu1 }
 0x209   :  { %v294_v32 = vpop.f32.mrb[2].mxu1 }
 0x20a   :  { %298 = vst [vmem:[#allocation8] sm:$0xff] %v292_v30  ;;  %v295_v33 = vadd.f32 %v328_v28, %v294_v32  ;;  %v394_v34 = vpop.f32.mrb[3].mxu1 }
 0x20c   :  { %299 = vst [vmem:[#allocation8 + $0x8] sm:$0xff] %v295_v33 }
 0x20d   :  { %499 = shalt.err (!%p496_p0)
}
 0x20e   :  { %s500_s10 = scalar_lea.hbm %s631_s5, 256 }
 0x20f   :  { %p501_p1 = scmp.ne.s32.totalorder %s631_s5, %s500_s10  ;;  %p504_p2 = scmp.lt.u32.totalorder %s500_s10, %s631_s5 }
 0x211   :  { %p506_p3 = pnand %p504_p2, %p501_p1 }
 0x213   :  { %509 = shalt.err (!%p506_p3)
}
 0x214   :  { %s524_s15 = smov 128   ;;  %s525_s16 = smov 8  }
 0x215   :  { %311 = dma.vmem_to_hbm [thread:$0]  %s306_s8, 256, %s631_s5, [#allocation4], %s524_s15, %s524_s15, %s525_s16  }
 0x216   :  { %514 = dma.done.wait [#allocation4], 256  }
 0x217   :  { %515 = vsyncadd [#allocation4], 4294967040 }
 0x218   :  { %315 = vsyncpa [#allocation3], 1 }
 0x219   :  { %316 = vsyncpa [#allocation6], 1 }
 0x21a   :  { %317 = vsyncpa [#allocation4], 1 }

</bundles_post_ra>
